<compile_context>
chip_gen: v7x
topology: tpu7x:2x2x1
jax: 0.10.0
libtpu: 0.0.40
codegen_flags: <defaults>
</compile_context>

<pallas_src>
import functools

import jax
import jax.numpy as jnp
from jax.experimental import pallas as pl
from jax.experimental.pallas import tpu as pltpu

BN_EPS = 1e-5


# ---------------------------------------------------------------------------
# kernel
# ---------------------------------------------------------------------------
def conv_stage_kernel(*refs, apply_affine):
    """One ConvBlock stage (conv3x3 + bias + ReLU + partial BN stats) for
    B_tile images, lane-dense layouts.

    refs (apply_affine=True):
      x_ref     : (B_tile, H, W*Cin)      input activation (f32 or bf16)
      scale_ref : (1, W*Cin)              fused BN affine of the previous stage
      shift_ref : (1, W*Cin)
      w_ref     : (W*Cin, 3*W*Cout)       banded weight slabs, kh stacked on N (bf16)
      b_ref     : (1, W*Cout)             conv bias tiled over W (f32)
      y_ref     : (B_tile, H, W*Cout)     conv + bias + ReLU output
      stats_ref : (1, 2, W*Cout)          partial [sum, sum of squares]
      xp_ref    : (B_tile*(H+2)+4, W*Cin) VMEM scratch, row-halo padded slab (bf16)
    """
    if apply_affine:
        (x_ref, scale_ref, shift_ref, w_ref, b_ref,
         y_ref, stats_ref, xp_ref) = refs
    else:
        x_ref, w_ref, b_ref, y_ref, stats_ref, xp_ref = refs
        scale_ref = shift_ref = None

    b_tile, h, k = x_ref.shape
    ncols = y_ref.shape[2]
    hp = h + 2
    m = b_tile * hp

    # fused per-channel affine on the input (BN of the previous stage), then a
    # single f32 -> bf16 cast feeding the MXU.
    x = x_ref[...]
    if apply_affine:
        z = x.astype(jnp.float32) * scale_ref[...] + shift_ref[...]
    else:
        z = x
    zb = z.astype(jnp.bfloat16)

    # Build the stacked, row-halo-padded slab.  Every store below starts at an
    # even sublane offset and covers an even number of rows, so no packed bf16
    # word is split (fast unmasked-ish stores).  Only halo/guard rows are
    # zeroed -- the interior is fully overwritten every step.
    zero2 = jnp.zeros((2, k), jnp.bfloat16)
    xp_ref[0:2, :] = zero2                       # rows 0-1: top halo of image 0
    for b in range(b_tile):
        base = 2 + b * hp
        xp_ref[base:base + h, :] = zb[b]         # interior rows of image b
        xp_ref[base + h:base + h + 2, :] = zero2  # bottom halo (= next top halo)
    xp_ref[2 + m:2 + m + 2, :] = zero2           # trailing guard rows

    # Whole 3x3 conv as ONE MXU matmul: LHS = full slab (loaded once), RHS =
    # the 3 kh tap slabs stacked along N.  kh row alignment is recovered with
    # f32 value slices (cheap sublane shifts, no packed relayouts).
    p = jnp.dot(xp_ref[...], w_ref[...], preferred_element_type=jnp.float32)
    acc = (p[1:1 + m, 0:ncols]
           + p[2:2 + m, ncols:2 * ncols]
           + p[3:3 + m, 2 * ncols:3 * ncols])    # (m, W*Cout), junk rows between images

    # per-image epilogue: bias + ReLU fused, one-pass partial BN statistics.
    bias = b_ref[...]
    ssum = jnp.zeros((1, ncols), jnp.float32)
    ssq = jnp.zeros((1, ncols), jnp.float32)
    for b in range(b_tile):
        yb = jnp.maximum(acc[b * hp:b * hp + h, :] + bias, 0.0)   # (H, W*Cout)
        y_ref[b] = yb.astype(y_ref.dtype)
        ssum = ssum + jnp.sum(yb, axis=0, keepdims=True)
        ssq = ssq + jnp.sum(yb * yb, axis=0, keepdims=True)
    stats_ref[0, 0:1, :] = ssum
    stats_ref[0, 1:2, :] = ssq


# ---------------------------------------------------------------------------
# wrappers
# ---------------------------------------------------------------------------
def _banded_weights_stacked(w_hwio, width):
    """Fold an HWIO (3,3,Cin,Cout) weight into banded slabs on the unpadded
    lane-dense layout (K = W*Cin; boundary kw taps drop out via eye shifts),
    with the 3 kh taps stacked along the output (N) dim."""
    cin, cout = w_hwio.shape[2], w_hwio.shape[3]
    slabs = []
    for kh in range(3):
        mat = jnp.zeros((width * cin, width * cout), jnp.float32)
        for kw in range(3):
            shift = jnp.eye(width, width, k=1 - kw, dtype=jnp.float32)
            mat = mat + jnp.kron(shift, w_hwio[kh, kw])
        slabs.append(mat)
    return jnp.concatenate(slabs, axis=1).astype(jnp.bfloat16)   # (W*Cin, 3*W*Cout)


def _tile_w(v, width):
    """(C,) or (1,C) per-channel vector -> (1, W*C) lane-dense broadcast."""
    return jnp.tile(v.reshape(1, -1), (1, width))


def prepare_params(p, width):
    """One-time parameter prep (outside the jitted forward)."""
    return dict(
        w1b=_banded_weights_stacked(p["w1"], width),
        w2b=_banded_weights_stacked(p["w2"], width),
        b1t=_tile_w(p["b1"], width).astype(jnp.float32),
        b2t=_tile_w(p["b2"], width).astype(jnp.float32),
        g1=p["g1"], be1=p["be1"], g2=p["g2"], be2=p["be2"],
    )


def _bn_affine(stats, count, gamma, beta):
    """Combine per-step partial sums -> training-mode BN as scale/shift."""
    c = gamma.size
    tot = jnp.sum(stats, axis=0).reshape(2, -1, c).sum(axis=1)   # (2, C)
    mean = tot[0] / count
    var = tot[1] / count - mean * mean          # biased batch variance
    inv_std = jax.lax.rsqrt(var + BN_EPS)
    scale = gamma.reshape(-1) * inv_std
    shift = beta.reshape(-1) - mean * scale
    return scale, shift


def _pick_b_tile(n, h, target_m=256):
    """Images per grid step: aim for M ~ target_m MXU rows, divide N evenly."""
    bt = max(1, min(n, target_m // (h + 2)))
    while n % bt:
        bt -= 1
    return bt


def _conv_stage(x_ld, scale_t, shift_t, w_stk, b_t, *, out_dtype,
                apply_affine, b_tile):
    n, h, k = x_ld.shape
    assert h % 2 == 0, "even H keeps bf16 scratch stores packed-word aligned"
    ncols = w_stk.shape[1] // 3
    steps = n // b_tile
    hp = h + 2

    in_specs = [pl.BlockSpec((b_tile, h, k), lambda i: (i, 0, 0))]
    args = [x_ld]
    if apply_affine:
        in_specs += [pl.BlockSpec((1, k), lambda i: (0, 0)),
                     pl.BlockSpec((1, k), lambda i: (0, 0))]
        args += [scale_t, shift_t]
    in_specs += [pl.BlockSpec((k, 3 * ncols), lambda i: (0, 0)),
                 pl.BlockSpec((1, ncols), lambda i: (0, 0))]
    args += [w_stk, b_t]

    return pl.pallas_call(
        functools.partial(conv_stage_kernel, apply_affine=apply_affine),
        grid=(steps,),
        in_specs=in_specs,
        out_specs=[
            pl.BlockSpec((b_tile, h, ncols), lambda i: (i, 0, 0)),
            pl.BlockSpec((1, 2, ncols), lambda i: (i, 0, 0)),
        ],
        out_shape=[
            jax.ShapeDtypeStruct((n, h, ncols), out_dtype),
            jax.ShapeDtypeStruct((steps, 2, ncols), jnp.float32),
        ],
        scratch_shapes=[pltpu.VMEM((b_tile * hp + 4, k), jnp.bfloat16)],
        compiler_params=pltpu.CompilerParams(
            dimension_semantics=("parallel",),
            vmem_limit_bytes=32 * 1024 * 1024),
    )(*args)


@jax.jit
def conv_block_forward(x_nchw, pp):
    """ConvBlock forward. x_nchw: (N, Cin, H, W) -> (N, Cout, H, W)."""
    n, cin, h, w = x_nchw.shape
    c2 = pp["w2b"].shape[1] // (3 * w)
    b_tile = _pick_b_tile(n, h)

    # interface adapter (NCHW -> lane-dense); intermediates stay lane-dense.
    x_ld = jnp.transpose(x_nchw, (0, 2, 3, 1)).reshape(n, h, w * cin)

    # stage 1: conv1 + bias + ReLU, partial BN1 stats; bf16 intermediate.
    y1, s1 = _conv_stage(x_ld, None, None, pp["w1b"], pp["b1t"],
                         out_dtype=jnp.bfloat16, apply_affine=False,
                         b_tile=b_tile)

    # BN1 (training-mode batch stats) folded into stage 2's input path.
    sc1, sh1 = _bn_affine(s1, n * h * w, pp["g1"], pp["be1"])
    y2, s2 = _conv_stage(y1, _tile_w(sc1, w), _tile_w(sh1, w),
                         pp["w2b"], pp["b2t"],
                         out_dtype=jnp.float32, apply_affine=True,
                         b_tile=b_tile)

    # BN2: global stats combine, then scale/shift fused (by XLA) with the
    # final NHWC -> NCHW transpose -- one output pass, no extra kernel.
    sc2, sh2 = _bn_affine(s2, n * h * w, pp["g2"], pp["be2"])
    out = (y2.reshape(n, h, w, c2) * sc2.reshape(1, 1, 1, -1)
           + sh2.reshape(1, 1, 1, -1))
    return jnp.transpose(out, (0, 3, 1, 2))


# ---------------------------------------------------------------------------
# pure-JAX reference (ground truth for the correctness check)
# ---------------------------------------------------------------------------
def _ref_stage(x, w, b, g, be):
    y = jax.lax.conv_general_dilated(
        x, w, window_strides=(1, 1), padding=((1, 1), (1, 1)),
        dimension_numbers=("NCHW", "HWIO", "NCHW"))
    y = y + b.reshape(1, -1, 1, 1)
    y = jnp.maximum(y, 0.0)
    m = jnp.mean(y, axis=(0, 2, 3), keepdims=True)
    v = jnp.mean(jnp.square(y - m), axis=(0, 2, 3), keepdims=True)
    return (y - m) * jax.lax.rsqrt(v + BN_EPS) * g.reshape(1, -1, 1, 1) \
        + be.reshape(1, -1, 1, 1)


def ref_forward(x, p):
    y = _ref_stage(x, p["w1"], p["b1"], p["g1"], p["be1"])
    return _ref_stage(y, p["w2"], p["b2"], p["g2"], p["be2"])


if __name__ == "__main__":
    key = jax.random.PRNGKey(0)
    ks = jax.random.split(key, 9)

    N, Cin, Cout, H, W = 2, 4, 8, 16, 16
    x = jax.random.normal(ks[0], (N, Cin, H, W), jnp.float32)

    # deterministic synthetic parameters (shapes per nn.Conv2d / nn.BatchNorm2d)
    params = dict(
        w1=0.1 * jax.random.normal(ks[1], (3, 3, Cin, Cout), jnp.float32),
        b1=0.1 * jax.random.normal(ks[2], (1, Cout), jnp.float32),
        g1=1.0 + 0.1 * jax.random.normal(ks[3], (1, Cout), jnp.float32),
        be1=0.1 * jax.random.normal(ks[4], (1, Cout), jnp.float32),
        w2=0.1 * jax.random.normal(ks[5], (3, 3, Cout, Cout), jnp.float32),
        b2=0.1 * jax.random.normal(ks[6], (1, Cout), jnp.float32),
        g2=1.0 + 0.1 * jax.random.normal(ks[7], (1, Cout), jnp.float32),
        be2=0.1 * jax.random.normal(ks[8], (1, Cout), jnp.float32),
    )

    prep = prepare_params(params, W)               # one-time parameter prep

    out = jax.block_until_ready(conv_block_forward(x, prep))
    ref = jax.block_until_ready(ref_forward(x, params))

    assert out.shape == (N, Cout, H, W), out.shape
    # bf16 matmul operands / bf16 y1 intermediate with f32 accumulation:
    # tightened vs the previous 2e-1 gate so banded-indexing bugs can't hide.
    max_err = float(jnp.max(jnp.abs(out - ref)))
    assert max_err < 1e-1, f"max abs error {max_err}"
    print("KERNEL_OK")
</pallas_src>

<mosaic_0001>
module attributes {stable_mosaic.version = 11 : i64} {
  func.func @conv_stage_kernel(%arg0: i32, %arg1: memref<2x16x64xf32, #tpu.memory_space<vmem>>, %arg2: memref<64x384xbf16, #tpu.memory_space<vmem>>, %arg3: memref<1x128xf32, #tpu.memory_space<vmem>>, %arg4: memref<2x16x128xbf16, #tpu.memory_space<vmem>>, %arg5: memref<1x2x128xf32, #tpu.memory_space<vmem>>, %arg6: memref<40x64xbf16, #tpu.memory_space<vmem>>) attributes {dimension_semantics = [#tpu.dimension_semantics<parallel>], iteration_bounds = array<i64: 1>, scalar_prefetch = 0 : i64, scratch_operands = 1 : i64, tpu.core_type = #tpu.core_type<tc>, window_params = [{transform_indices = @transform_0, window_bounds = array<i64: 2, 16, 64>}, {pipeline_mode = #tpu.pipeline_mode<synchronous>, transform_indices = @transform_1, window_bounds = array<i64: 64, 384>}, {pipeline_mode = #tpu.pipeline_mode<synchronous>, transform_indices = @transform_2, window_bounds = array<i64: 1, 128>}, {transform_indices = @transform_3, window_bounds = array<i64: 2, 16, 128>}, {transform_indices = @transform_4, window_bounds = array<i64: 1, 2, 128>}]} {
    %c0 = arith.constant 0 : index
    %c0_0 = arith.constant 0 : index
    %c0_1 = arith.constant 0 : index
    %0 = vector.load %arg1[%c0, %c0_0, %c0_1] : memref<2x16x64xf32, #tpu.memory_space<vmem>>, vector<2x16x64xf32>
    %1 = arith.truncf %0 : vector<2x16x64xf32> to vector<2x16x64xbf16>
    %cst = arith.constant 0.000000e+00 : bf16
    %2 = vector.broadcast %cst : bf16 to vector<2x64xbf16>
    %c0_2 = arith.constant 0 : index
    %c0_3 = arith.constant 0 : index
    %3 = vector.load %arg6[%c0_2, %c0_3] : memref<40x64xbf16, #tpu.memory_space<vmem>>, vector<2x64xbf16>
    tpu.vector_store %arg6[%c0_2, %c0_3], %2 {strides = array<i32>} : memref<40x64xbf16, #tpu.memory_space<vmem>>, vector<2x64xbf16>,
    %4 = vector.extract_strided_slice %1 {offsets = [0, 0, 0], sizes = [1, 16, 64], strides = [1, 1, 1]} : vector<2x16x64xbf16> to vector<1x16x64xbf16>
    %5 = vector.shape_cast %4 : vector<1x16x64xbf16> to vector<16x64xbf16>
    %c2 = arith.constant 2 : index
    %c0_4 = arith.constant 0 : index
    %6 = vector.load %arg6[%c2, %c0_4] : memref<40x64xbf16, #tpu.memory_space<vmem>>, vector<16x64xbf16>
    tpu.vector_store %arg6[%c2, %c0_4], %5 {strides = array<i32>} : memref<40x64xbf16, #tpu.memory_space<vmem>>, vector<16x64xbf16>,
    %c18 = arith.constant 18 : index
    %c0_5 = arith.constant 0 : index
    %7 = vector.load %arg6[%c18, %c0_5] : memref<40x64xbf16, #tpu.memory_space<vmem>>, vector<2x64xbf16>
    tpu.vector_store %arg6[%c18, %c0_5], %2 {strides = array<i32>} : memref<40x64xbf16, #tpu.memory_space<vmem>>, vector<2x64xbf16>,
    %8 = vector.extract_strided_slice %1 {offsets = [1, 0, 0], sizes = [1, 16, 64], strides = [1, 1, 1]} : vector<2x16x64xbf16> to vector<1x16x64xbf16>
    %9 = vector.shape_cast %8 : vector<1x16x64xbf16> to vector<16x64xbf16>
    %c20 = arith.constant 20 : index
    %c0_6 = arith.constant 0 : index
    %10 = vector.load %arg6[%c20, %c0_6] : memref<40x64xbf16, #tpu.memory_space<vmem>>, vector<16x64xbf16>
    tpu.vector_store %arg6[%c20, %c0_6], %9 {strides = array<i32>} : memref<40x64xbf16, #tpu.memory_space<vmem>>, vector<16x64xbf16>,
    %c36 = arith.constant 36 : index
    %c0_7 = arith.constant 0 : index
    %11 = vector.load %arg6[%c36, %c0_7] : memref<40x64xbf16, #tpu.memory_space<vmem>>, vector<2x64xbf16>
    tpu.vector_store %arg6[%c36, %c0_7], %2 {strides = array<i32>} : memref<40x64xbf16, #tpu.memory_space<vmem>>, vector<2x64xbf16>,
    %c38 = arith.constant 38 : index
    %c0_8 = arith.constant 0 : index
    %12 = vector.load %arg6[%c38, %c0_8] : memref<40x64xbf16, #tpu.memory_space<vmem>>, vector<2x64xbf16>
    tpu.vector_store %arg6[%c38, %c0_8], %2 {strides = array<i32>} : memref<40x64xbf16, #tpu.memory_space<vmem>>, vector<2x64xbf16>,
    %c0_9 = arith.constant 0 : index
    %c0_10 = arith.constant 0 : index
    %13 = vector.load %arg6[%c0_9, %c0_10] : memref<40x64xbf16, #tpu.memory_space<vmem>>, vector<40x64xbf16>
    %c0_11 = arith.constant 0 : index
    %c0_12 = arith.constant 0 : index
    %14 = vector.load %arg2[%c0_11, %c0_12] : memref<64x384xbf16, #tpu.memory_space<vmem>>, vector<64x384xbf16>
    %cst_13 = arith.constant dense<0.000000e+00> : vector<40x384xf32>
    %15 = tpu.matmul %13, %14, %cst_13 {dimension_numbers = #tpu.dot_dimension_numbers<[1], [0], [0], [1], [0, 0, 1, 1], [], []>} : vector<40x64xbf16>, vector<64x384xbf16>, vector<40x384xf32> -> vector<40x384xf32>
    %16 = vector.extract_strided_slice %15 {offsets = [1, 0], sizes = [36, 128], strides = [1, 1]} : vector<40x384xf32> to vector<36x128xf32>
    %17 = vector.extract_strided_slice %15 {offsets = [2, 128], sizes = [36, 128], strides = [1, 1]} : vector<40x384xf32> to vector<36x128xf32>
    %18 = arith.addf %16, %17 : vector<36x128xf32>
    %19 = vector.extract_strided_slice %15 {offsets = [3, 256], sizes = [36, 128], strides = [1, 1]} : vector<40x384xf32> to vector<36x128xf32>
    %20 = arith.addf %18, %19 : vector<36x128xf32>
    %c0_14 = arith.constant 0 : index
    %c0_15 = arith.constant 0 : index
    %21 = vector.load %arg3[%c0_14, %c0_15] : memref<1x128xf32, #tpu.memory_space<vmem>>, vector<1x128xf32>
    %cst_16 = arith.constant 0.000000e+00 : f32
    %22 = vector.broadcast %cst_16 : f32 to vector<1x128xf32>
    %cst_17 = arith.constant 0.000000e+00 : f32
    %23 = vector.broadcast %cst_17 : f32 to vector<1x128xf32>
    %24 = vector.extract_strided_slice %20 {offsets = [0, 0], sizes = [16, 128], strides = [1, 1]} : vector<36x128xf32> to vector<16x128xf32>
    %25 = vector.broadcast %21 : vector<1x128xf32> to vector<16x128xf32>
    %26 = arith.addf %24, %25 : vector<16x128xf32>
    %cst_18 = arith.constant 0.000000e+00 : f32
    %27 = vector.broadcast %cst_18 : f32 to vector<16x128xf32>
    %28 = arith.maximumf %26, %27 : vector<16x128xf32>
    %29 = arith.truncf %28 : vector<16x128xf32> to vector<16x128xbf16>
    %c0_19 = arith.constant 0 : index
    %c0_20 = arith.constant 0 : index
    %c0_21 = arith.constant 0 : index
    %30 = vector.load %arg4[%c0_19, %c0_20, %c0_21] : memref<2x16x128xbf16, #tpu.memory_space<vmem>>, vector<1x16x128xbf16>
    %31 = vector.shape_cast %30 : vector<1x16x128xbf16> to vector<16x128xbf16>
    %32 = vector.shape_cast %29 : vector<16x128xbf16> to vector<1x16x128xbf16>
    tpu.vector_store %arg4[%c0_19, %c0_20, %c0_21], %32 {strides = array<i32>} : memref<2x16x128xbf16, #tpu.memory_space<vmem>>, vector<1x16x128xbf16>,
    %cst_22 = arith.constant dense<0.000000e+00> : vector<128xf32>
    %33 = vector.multi_reduction <add>, %28, %cst_22 [0] : vector<16x128xf32> to vector<128xf32>
    %34 = vector.shape_cast %33 : vector<128xf32> to vector<1x128xf32>
    %35 = arith.addf %22, %34 : vector<1x128xf32>
    %36 = arith.mulf %28, %28 : vector<16x128xf32>
    %cst_23 = arith.constant dense<0.000000e+00> : vector<128xf32>
    %37 = vector.multi_reduction <add>, %36, %cst_23 [0] : vector<16x128xf32> to vector<128xf32>
    %38 = vector.shape_cast %37 : vector<128xf32> to vector<1x128xf32>
    %39 = arith.addf %23, %38 : vector<1x128xf32>
    %40 = vector.extract_strided_slice %20 {offsets = [18, 0], sizes = [16, 128], strides = [1, 1]} : vector<36x128xf32> to vector<16x128xf32>
    %41 = vector.broadcast %21 : vector<1x128xf32> to vector<16x128xf32>
    %42 = arith.addf %40, %41 : vector<16x128xf32>
    %cst_24 = arith.constant 0.000000e+00 : f32
    %43 = vector.broadcast %cst_24 : f32 to vector<16x128xf32>
    %44 = arith.maximumf %42, %43 : vector<16x128xf32>
    %45 = arith.truncf %44 : vector<16x128xf32> to vector<16x128xbf16>
    %c1 = arith.constant 1 : index
    %c0_25 = arith.constant 0 : index
    %c0_26 = arith.constant 0 : index
    %46 = vector.load %arg4[%c1, %c0_25, %c0_26] : memref<2x16x128xbf16, #tpu.memory_space<vmem>>, vector<1x16x128xbf16>
    %47 = vector.shape_cast %46 : vector<1x16x128xbf16> to vector<16x128xbf16>
    %48 = vector.shape_cast %45 : vector<16x128xbf16> to vector<1x16x128xbf16>
    tpu.vector_store %arg4[%c1, %c0_25, %c0_26], %48 {strides = array<i32>} : memref<2x16x128xbf16, #tpu.memory_space<vmem>>, vector<1x16x128xbf16>,
    %cst_27 = arith.constant dense<0.000000e+00> : vector<128xf32>
    %49 = vector.multi_reduction <add>, %44, %cst_27 [0] : vector<16x128xf32> to vector<128xf32>
    %50 = vector.shape_cast %49 : vector<128xf32> to vector<1x128xf32>
    %51 = arith.addf %35, %50 : vector<1x128xf32>
    %52 = arith.mulf %44, %44 : vector<16x128xf32>
    %cst_28 = arith.constant dense<0.000000e+00> : vector<128xf32>
    %53 = vector.multi_reduction <add>, %52, %cst_28 [0] : vector<16x128xf32> to vector<128xf32>
    %54 = vector.shape_cast %53 : vector<128xf32> to vector<1x128xf32>
    %55 = arith.addf %39, %54 : vector<1x128xf32>
    %c0_29 = arith.constant 0 : index
    %c0_30 = arith.constant 0 : index
    %c0_31 = arith.constant 0 : index
    %56 = vector.load %arg5[%c0_29, %c0_30, %c0_31] : memref<1x2x128xf32, #tpu.memory_space<vmem>>, vector<1x1x128xf32>
    %57 = vector.shape_cast %56 : vector<1x1x128xf32> to vector<1x128xf32>
    %58 = vector.shape_cast %51 : vector<1x128xf32> to vector<1x1x128xf32>
    tpu.vector_store %arg5[%c0_29, %c0_30, %c0_31], %58 {strides = array<i32>} : memref<1x2x128xf32, #tpu.memory_space<vmem>>, vector<1x1x128xf32>,
    %c0_32 = arith.constant 0 : index
    %c1_33 = arith.constant 1 : index
    %c0_34 = arith.constant 0 : index
    %59 = vector.load %arg5[%c0_32, %c1_33, %c0_34] : memref<1x2x128xf32, #tpu.memory_space<vmem>>, vector<1x1x128xf32>
    %60 = vector.shape_cast %59 : vector<1x1x128xf32> to vector<1x128xf32>
    %61 = vector.shape_cast %55 : vector<1x128xf32> to vector<1x1x128xf32>
    tpu.vector_store %arg5[%c0_32, %c1_33, %c0_34], %61 {strides = array<i32>} : memref<1x2x128xf32, #tpu.memory_space<vmem>>, vector<1x1x128xf32>,
    return
  }
  func.func @transform_0(%arg0: i32) -> (i32, i32, i32) {
    %c0_i32 = arith.constant 0 : i32
    %c0_i32_0 = arith.constant 0 : i32
    %c0_i32_1 = arith.constant 0 : i32
    return %arg0, %c0_i32, %c0_i32_0 : i32, i32, i32
  }
  func.func @transform_1(%arg0: i32) -> (i32, i32) {
    %c0_i32 = arith.constant 0 : i32
    %c0_i32_0 = arith.constant 0 : i32
    %c0_i32_1 = arith.constant 0 : i32
    return %c0_i32, %c0_i32_0 : i32, i32
  }
  func.func @transform_2(%arg0: i32) -> (i32, i32) {
    %c0_i32 = arith.constant 0 : i32
    %c0_i32_0 = arith.constant 0 : i32
    %c0_i32_1 = arith.constant 0 : i32
    return %c0_i32, %c0_i32_0 : i32, i32
  }
  func.func @transform_3(%arg0: i32) -> (i32, i32, i32) {
    %c0_i32 = arith.constant 0 : i32
    %c0_i32_0 = arith.constant 0 : i32
    %c0_i32_1 = arith.constant 0 : i32
    return %arg0, %c0_i32, %c0_i32_0 : i32, i32, i32
  }
  func.func @transform_4(%arg0: i32) -> (i32, i32, i32) {
    %c0_i32 = arith.constant 0 : i32
    %c0_i32_0 = arith.constant 0 : i32
    %c0_i32_1 = arith.constant 0 : i32
    return %arg0, %c0_i32, %c0_i32_0 : i32, i32, i32
  }
}

module attributes {stable_mosaic.version = 11 : i64} {
  func.func @conv_stage_kernel(%arg0: i32, %arg1: memref<2x16x128xbf16, #tpu.memory_space<vmem>>, %arg2: memref<1x128xf32, #tpu.memory_space<vmem>>, %arg3: memref<1x128xf32, #tpu.memory_space<vmem>>, %arg4: memref<128x384xbf16, #tpu.memory_space<vmem>>, %arg5: memref<1x128xf32, #tpu.memory_space<vmem>>, %arg6: memref<2x16x128xf32, #tpu.memory_space<vmem>>, %arg7: memref<1x2x128xf32, #tpu.memory_space<vmem>>, %arg8: memref<40x128xbf16, #tpu.memory_space<vmem>>) attributes {dimension_semantics = [#tpu.dimension_semantics<parallel>], iteration_bounds = array<i64: 1>, scalar_prefetch = 0 : i64, scratch_operands = 1 : i64, tpu.core_type = #tpu.core_type<tc>, window_params = [{transform_indices = @transform_0, window_bounds = array<i64: 2, 16, 128>}, {pipeline_mode = #tpu.pipeline_mode<synchronous>, transform_indices = @transform_1, window_bounds = array<i64: 1, 128>}, {pipeline_mode = #tpu.pipeline_mode<synchronous>, transform_indices = @transform_2, window_bounds = array<i64: 1, 128>}, {pipeline_mode = #tpu.pipeline_mode<synchronous>, transform_indices = @transform_3, window_bounds = array<i64: 128, 384>}, {pipeline_mode = #tpu.pipeline_mode<synchronous>, transform_indices = @transform_4, window_bounds = array<i64: 1, 128>}, {transform_indices = @transform_5, window_bounds = array<i64: 2, 16, 128>}, {transform_indices = @transform_6, window_bounds = array<i64: 1, 2, 128>}]} {
    %c0 = arith.constant 0 : index
    %c0_0 = arith.constant 0 : index
    %c0_1 = arith.constant 0 : index
    %0 = vector.load %arg1[%c0, %c0_0, %c0_1] : memref<2x16x128xbf16, #tpu.memory_space<vmem>>, vector<2x16x128xbf16>
    %1 = arith.extf %0 : vector<2x16x128xbf16> to vector<2x16x128xf32>
    %c0_2 = arith.constant 0 : index
    %c0_3 = arith.constant 0 : index
    %2 = vector.load %arg2[%c0_2, %c0_3] : memref<1x128xf32, #tpu.memory_space<vmem>>, vector<1x128xf32>
    %3 = vector.shape_cast %2 : vector<1x128xf32> to vector<1x1x128xf32>
    %4 = vector.broadcast %3 : vector<1x1x128xf32> to vector<2x16x128xf32>
    %5 = arith.mulf %1, %4 : vector<2x16x128xf32>
    %c0_4 = arith.constant 0 : index
    %c0_5 = arith.constant 0 : index
    %6 = vector.load %arg3[%c0_4, %c0_5] : memref<1x128xf32, #tpu.memory_space<vmem>>, vector<1x128xf32>
    %7 = vector.shape_cast %6 : vector<1x128xf32> to vector<1x1x128xf32>
    %8 = vector.broadcast %7 : vector<1x1x128xf32> to vector<2x16x128xf32>
    %9 = arith.addf %5, %8 : vector<2x16x128xf32>
    %10 = arith.truncf %9 : vector<2x16x128xf32> to vector<2x16x128xbf16>
    %cst = arith.constant 0.000000e+00 : bf16
    %11 = vector.broadcast %cst : bf16 to vector<2x128xbf16>
    %c0_6 = arith.constant 0 : index
    %c0_7 = arith.constant 0 : index
    %12 = vector.load %arg8[%c0_6, %c0_7] : memref<40x128xbf16, #tpu.memory_space<vmem>>, vector<2x128xbf16>
    tpu.vector_store %arg8[%c0_6, %c0_7], %11 {strides = array<i32>} : memref<40x128xbf16, #tpu.memory_space<vmem>>, vector<2x128xbf16>,
    %13 = vector.extract_strided_slice %10 {offsets = [0, 0, 0], sizes = [1, 16, 128], strides = [1, 1, 1]} : vector<2x16x128xbf16> to vector<1x16x128xbf16>
    %14 = vector.shape_cast %13 : vector<1x16x128xbf16> to vector<16x128xbf16>
    %c2 = arith.constant 2 : index
    %c0_8 = arith.constant 0 : index
    %15 = vector.load %arg8[%c2, %c0_8] : memref<40x128xbf16, #tpu.memory_space<vmem>>, vector<16x128xbf16>
    tpu.vector_store %arg8[%c2, %c0_8], %14 {strides = array<i32>} : memref<40x128xbf16, #tpu.memory_space<vmem>>, vector<16x128xbf16>,
    %c18 = arith.constant 18 : index
    %c0_9 = arith.constant 0 : index
    %16 = vector.load %arg8[%c18, %c0_9] : memref<40x128xbf16, #tpu.memory_space<vmem>>, vector<2x128xbf16>
    tpu.vector_store %arg8[%c18, %c0_9], %11 {strides = array<i32>} : memref<40x128xbf16, #tpu.memory_space<vmem>>, vector<2x128xbf16>,
    %17 = vector.extract_strided_slice %10 {offsets = [1, 0, 0], sizes = [1, 16, 128], strides = [1, 1, 1]} : vector<2x16x128xbf16> to vector<1x16x128xbf16>
    %18 = vector.shape_cast %17 : vector<1x16x128xbf16> to vector<16x128xbf16>
    %c20 = arith.constant 20 : index
    %c0_10 = arith.constant 0 : index
    %19 = vector.load %arg8[%c20, %c0_10] : memref<40x128xbf16, #tpu.memory_space<vmem>>, vector<16x128xbf16>
    tpu.vector_store %arg8[%c20, %c0_10], %18 {strides = array<i32>} : memref<40x128xbf16, #tpu.memory_space<vmem>>, vector<16x128xbf16>,
    %c36 = arith.constant 36 : index
    %c0_11 = arith.constant 0 : index
    %20 = vector.load %arg8[%c36, %c0_11] : memref<40x128xbf16, #tpu.memory_space<vmem>>, vector<2x128xbf16>
    tpu.vector_store %arg8[%c36, %c0_11], %11 {strides = array<i32>} : memref<40x128xbf16, #tpu.memory_space<vmem>>, vector<2x128xbf16>,
    %c38 = arith.constant 38 : index
    %c0_12 = arith.constant 0 : index
    %21 = vector.load %arg8[%c38, %c0_12] : memref<40x128xbf16, #tpu.memory_space<vmem>>, vector<2x128xbf16>
    tpu.vector_store %arg8[%c38, %c0_12], %11 {strides = array<i32>} : memref<40x128xbf16, #tpu.memory_space<vmem>>, vector<2x128xbf16>,
    %c0_13 = arith.constant 0 : index
    %c0_14 = arith.constant 0 : index
    %22 = vector.load %arg8[%c0_13, %c0_14] : memref<40x128xbf16, #tpu.memory_space<vmem>>, vector<40x128xbf16>
    %c0_15 = arith.constant 0 : index
    %c0_16 = arith.constant 0 : index
    %23 = vector.load %arg4[%c0_15, %c0_16] : memref<128x384xbf16, #tpu.memory_space<vmem>>, vector<128x384xbf16>
    %cst_17 = arith.constant dense<0.000000e+00> : vector<40x384xf32>
    %24 = tpu.matmul %22, %23, %cst_17 {dimension_numbers = #tpu.dot_dimension_numbers<[1], [0], [0], [1], [0, 0, 1, 1], [], []>} : vector<40x128xbf16>, vector<128x384xbf16>, vector<40x384xf32> -> vector<40x384xf32>
    %25 = vector.extract_strided_slice %24 {offsets = [1, 0], sizes = [36, 128], strides = [1, 1]} : vector<40x384xf32> to vector<36x128xf32>
    %26 = vector.extract_strided_slice %24 {offsets = [2, 128], sizes = [36, 128], strides = [1, 1]} : vector<40x384xf32> to vector<36x128xf32>
    %27 = arith.addf %25, %26 : vector<36x128xf32>
    %28 = vector.extract_strided_slice %24 {offsets = [3, 256], sizes = [36, 128], strides = [1, 1]} : vector<40x384xf32> to vector<36x128xf32>
    %29 = arith.addf %27, %28 : vector<36x128xf32>
    %c0_18 = arith.constant 0 : index
    %c0_19 = arith.constant 0 : index
    %30 = vector.load %arg5[%c0_18, %c0_19] : memref<1x128xf32, #tpu.memory_space<vmem>>, vector<1x128xf32>
    %cst_20 = arith.constant 0.000000e+00 : f32
    %31 = vector.broadcast %cst_20 : f32 to vector<1x128xf32>
    %cst_21 = arith.constant 0.000000e+00 : f32
    %32 = vector.broadcast %cst_21 : f32 to vector<1x128xf32>
    %33 = vector.extract_strided_slice %29 {offsets = [0, 0], sizes = [16, 128], strides = [1, 1]} : vector<36x128xf32> to vector<16x128xf32>
    %34 = vector.broadcast %30 : vector<1x128xf32> to vector<16x128xf32>
    %35 = arith.addf %33, %34 : vector<16x128xf32>
    %cst_22 = arith.constant 0.000000e+00 : f32
    %36 = vector.broadcast %cst_22 : f32 to vector<16x128xf32>
    %37 = arith.maximumf %35, %36 : vector<16x128xf32>
    %c0_23 = arith.constant 0 : index
    %c0_24 = arith.constant 0 : index
    %c0_25 = arith.constant 0 : index
    %38 = vector.load %arg6[%c0_23, %c0_24, %c0_25] : memref<2x16x128xf32, #tpu.memory_space<vmem>>, vector<1x16x128xf32>
    %39 = vector.shape_cast %38 : vector<1x16x128xf32> to vector<16x128xf32>
    %40 = vector.shape_cast %37 : vector<16x128xf32> to vector<1x16x128xf32>
    tpu.vector_store %arg6[%c0_23, %c0_24, %c0_25], %40 {strides = array<i32>} : memref<2x16x128xf32, #tpu.memory_space<vmem>>, vector<1x16x128xf32>,
    %cst_26 = arith.constant dense<0.000000e+00> : vector<128xf32>
    %41 = vector.multi_reduction <add>, %37, %cst_26 [0] : vector<16x128xf32> to vector<128xf32>
    %42 = vector.shape_cast %41 : vector<128xf32> to vector<1x128xf32>
    %43 = arith.addf %31, %42 : vector<1x128xf32>
    %44 = arith.mulf %37, %37 : vector<16x128xf32>
    %cst_27 = arith.constant dense<0.000000e+00> : vector<128xf32>
    %45 = vector.multi_reduction <add>, %44, %cst_27 [0] : vector<16x128xf32> to vector<128xf32>
    %46 = vector.shape_cast %45 : vector<128xf32> to vector<1x128xf32>
    %47 = arith.addf %32, %46 : vector<1x128xf32>
    %48 = vector.extract_strided_slice %29 {offsets = [18, 0], sizes = [16, 128], strides = [1, 1]} : vector<36x128xf32> to vector<16x128xf32>
    %49 = vector.broadcast %30 : vector<1x128xf32> to vector<16x128xf32>
    %50 = arith.addf %48, %49 : vector<16x128xf32>
    %cst_28 = arith.constant 0.000000e+00 : f32
    %51 = vector.broadcast %cst_28 : f32 to vector<16x128xf32>
    %52 = arith.maximumf %50, %51 : vector<16x128xf32>
    %c1 = arith.constant 1 : index
    %c0_29 = arith.constant 0 : index
    %c0_30 = arith.constant 0 : index
    %53 = vector.load %arg6[%c1, %c0_29, %c0_30] : memref<2x16x128xf32, #tpu.memory_space<vmem>>, vector<1x16x128xf32>
    %54 = vector.shape_cast %53 : vector<1x16x128xf32> to vector<16x128xf32>
    %55 = vector.shape_cast %52 : vector<16x128xf32> to vector<1x16x128xf32>
    tpu.vector_store %arg6[%c1, %c0_29, %c0_30], %55 {strides = array<i32>} : memref<2x16x128xf32, #tpu.memory_space<vmem>>, vector<1x16x128xf32>,
    %cst_31 = arith.constant dense<0.000000e+00> : vector<128xf32>
    %56 = vector.multi_reduction <add>, %52, %cst_31 [0] : vector<16x128xf32> to vector<128xf32>
    %57 = vector.shape_cast %56 : vector<128xf32> to vector<1x128xf32>
    %58 = arith.addf %43, %57 : vector<1x128xf32>
    %59 = arith.mulf %52, %52 : vector<16x128xf32>
    %cst_32 = arith.constant dense<0.000000e+00> : vector<128xf32>
    %60 = vector.multi_reduction <add>, %59, %cst_32 [0] : vector<16x128xf32> to vector<128xf32>
    %61 = vector.shape_cast %60 : vector<128xf32> to vector<1x128xf32>
    %62 = arith.addf %47, %61 : vector<1x128xf32>
    %c0_33 = arith.constant 0 : index
    %c0_34 = arith.constant 0 : index
    %c0_35 = arith.constant 0 : index
    %63 = vector.load %arg7[%c0_33, %c0_34, %c0_35] : memref<1x2x128xf32, #tpu.memory_space<vmem>>, vector<1x1x128xf32>
    %64 = vector.shape_cast %63 : vector<1x1x128xf32> to vector<1x128xf32>
    %65 = vector.shape_cast %58 : vector<1x128xf32> to vector<1x1x128xf32>
    tpu.vector_store %arg7[%c0_33, %c0_34, %c0_35], %65 {strides = array<i32>} : memref<1x2x128xf32, #tpu.memory_space<vmem>>, vector<1x1x128xf32>,
    %c0_36 = arith.constant 0 : index
    %c1_37 = arith.constant 1 : index
    %c0_38 = arith.constant 0 : index
    %66 = vector.load %arg7[%c0_36, %c1_37, %c0_38] : memref<1x2x128xf32, #tpu.memory_space<vmem>>, vector<1x1x128xf32>
    %67 = vector.shape_cast %66 : vector<1x1x128xf32> to vector<1x128xf32>
    %68 = vector.shape_cast %62 : vector<1x128xf32> to vector<1x1x128xf32>
    tpu.vector_store %arg7[%c0_36, %c1_37, %c0_38], %68 {strides = array<i32>} : memref<1x2x128xf32, #tpu.memory_space<vmem>>, vector<1x1x128xf32>,
    return
  }
  func.func @transform_0(%arg0: i32) -> (i32, i32, i32) {
    %c0_i32 = arith.constant 0 : i32
    %c0_i32_0 = arith.constant 0 : i32
    %c0_i32_1 = arith.constant 0 : i32
    return %arg0, %c0_i32, %c0_i32_0 : i32, i32, i32
  }
  func.func @transform_1(%arg0: i32) -> (i32, i32) {
    %c0_i32 = arith.constant 0 : i32
    %c0_i32_0 = arith.constant 0 : i32
    %c0_i32_1 = arith.constant 0 : i32
    return %c0_i32, %c0_i32_0 : i32, i32
  }
  func.func @transform_2(%arg0: i32) -> (i32, i32) {
    %c0_i32 = arith.constant 0 : i32
    %c0_i32_0 = arith.constant 0 : i32
    %c0_i32_1 = arith.constant 0 : i32
    return %c0_i32, %c0_i32_0 : i32, i32
  }
  func.func @transform_3(%arg0: i32) -> (i32, i32) {
    %c0_i32 = arith.constant 0 : i32
    %c0_i32_0 = arith.constant 0 : i32
    %c0_i32_1 = arith.constant 0 : i32
    return %c0_i32, %c0_i32_0 : i32, i32
  }
  func.func @transform_4(%arg0: i32) -> (i32, i32) {
    %c0_i32 = arith.constant 0 : i32
    %c0_i32_0 = arith.constant 0 : i32
    %c0_i32_1 = arith.constant 0 : i32
    return %c0_i32, %c0_i32_0 : i32, i32
  }
  func.func @transform_5(%arg0: i32) -> (i32, i32, i32) {
    %c0_i32 = arith.constant 0 : i32
    %c0_i32_0 = arith.constant 0 : i32
    %c0_i32_1 = arith.constant 0 : i32
    return %arg0, %c0_i32, %c0_i32_0 : i32, i32, i32
  }
  func.func @transform_6(%arg0: i32) -> (i32, i32, i32) {
    %c0_i32 = arith.constant 0 : i32
    %c0_i32_0 = arith.constant 0 : i32
    %c0_i32_1 = arith.constant 0 : i32
    return %arg0, %c0_i32, %c0_i32_0 : i32, i32, i32
  }
}

</mosaic_0001>

<bundles_post_ra>
// kernel: conv_block_forward.2
= control target key start
LH: loop header
LB: loop body
LE: loop exit
PB: predicated region body
PF: predicated region fallthrough
CT: control target
= control target key end

     0   :  { %vm23_vm0 = vcmask 516096   ;;  %v631_v0 = vmov 0.0   ;;  %vm632_vm1 = vmmov 0   ;;  %v633_v2 = vmov 0   ;;  %s797_s1 = inlined_call_operand.vmem [shape: bf16[64,384], index: 1, kind: input, shape index: {}]   ;;  %s798_s0 = inlined_call_operand.vmem [shape: f32[2,16,64], index: 0, kind: input, shape index: {}]   ;;  %s799_s2 = inlined_call_operand.vmem [shape: f32[1,128], index: 2, kind: input, shape index: {}]   ;;  %s800_s3 = inlined_call_operand.vmem [shape: bf16[2,16,128], index: 3, kind: output, shape index: {0}]   ;;  %s801_s4 = inlined_call_operand.vmem [shape: f32[1,2,128], index: 4, kind: output, shape index: {1}]  }
   0x1   :  { %589 = vmatprep.subr.bf16.mxu1 %v631_v0  ;;  %v612_v1 = vld [vmem:[%s797_s1 + $0x4] ss:$12 sps:$4 sm:$0xff]   ;;  %597 = vmatprep.mubr.msk.bf16.mxu1 %vm632_vm1, %v631_v0  ;;  %24 = vst.msk [vmem:[#allocation2] sm:$0x1] %vm23_vm0, %v633_v2  ;;  %v614_v3 = vld [vmem:[%s797_s1 + $0x8] ss:$12 sps:$4 sm:$0xff]  }
   0x2   :  { %213 = vmatprep.mubr.bf16.mxu0 %v633_v2  ;;  %181 = vmatprep.subr.bf16.mxu0 %v612_v1  ;;  %v615_v4 = vld [vmem:[%s797_s1] ss:$12 sps:$4 sm:$0xff]   ;;  %vm46_vm2 = vcmask 517121   ;;  %v616_v5 = vld [vmem:[%s797_s1 + $0x1c] ss:$12 sps:$4 sm:$0xff]   ;;  %vm30_vm3 = vcmask 1040384  }
   0x3   :  { %590 = vmatpush3.bf16.msra.mxu1 %v614_v3  ;;  %47 = vst.msk [vmem:[#allocation2 + $0x8] sm:$0x2] %vm46_vm2, %v633_v2  ;;  %182 = vmatpush1.bf16.msra.mxu0 %v615_v4  ;;  %v618_v6 = vld [vmem:[%s797_s1 + $0x20] ss:$12 sps:$4 sm:$0xff]   ;;  %v619_v7 = vld [vmem:[%s797_s1 + $0x18] ss:$12 sps:$4 sm:$0xff]  }
   0x4   :  { %591 = vmatprep.subr.bf16.mxu1 %v631_v0  ;;  %183 = vmatprep.subr.bf16.mxu0 %v616_v5  ;;  %v620_v8 = vld [vmem:[%s797_s1 + $0x34] ss:$12 sps:$4 sm:$0xff]   ;;  %v622_v9 = vld [vmem:[%s797_s1 + $0x38] ss:$12 sps:$4 sm:$0xff]   ;;  %v623_v10 = vld [vmem:[%s797_s1 + $0x30] ss:$12 sps:$4 sm:$0xff]  }
   0x5   :  { %v624_v11 = vld [vmem:[%s797_s1 + $0x4c] ss:$12 sps:$4 sm:$0xff]   ;;  %v17_v12 = vld [vmem:[%s798_s0] sm:$0xff]  ;;  %v19_v14 = vld [vmem:[%s798_s0 + $0x10] sm:$0xff]  ;;  %vm31_vm4 = vcmask 1044484   ;;  %vm53_vm5 = vcmask 1041408  }
   0x6   :  { %v18_v13 = vld [vmem:[%s798_s0 + $0x8] sm:$0xff]  ;;  %v20_v15 = vld [vmem:[%s798_s0 + $0x18] sm:$0xff]  ;;  %v572_v16 = vpack.c.bf16 %v17_v12, %v17_v12  ;;  %v574_v19 = vpack.c.bf16 %v19_v14, %v19_v14  ;;  %vm54_vm6 = vcmask 1045508   ;;  %vm41_vm7 = vcmask 519169   ;;  %vm32_vm9 = vmor %vm30_vm3, %vm31_vm4 }
   0x7   :  { %592 = vmatpush3.bf16.msra.mxu1 %v618_v6  ;;  %184 = vmatpush1.bf16.msra.mxu0 %v619_v7  ;;  %v573_v17 = vpack.c.bf16 %v18_v13, %v18_v13  ;;  %v626_v18 = vld [vmem:[%s797_s1 + $0x50] ss:$12 sps:$4 sm:$0xff]   ;;  %v575_v20 = vpack.c.bf16 %v20_v15, %v20_v15  ;;  %v627_v21 = vld [vmem:[%s797_s1 + $0x48] ss:$12 sps:$4 sm:$0xff]   ;;  %vm64_vm8 = vcmask 519170   ;;  %vm43_vm10 = vcmask 519168   ;;  %vm55_vm11 = vmor %vm53_vm5, %vm54_vm6 }
   0x8   :  { %593 = vmatprep.subr.bf16.mxu1 %v631_v0  ;;  %185 = vmatprep.subr.bf16.mxu0 %v620_v8  ;;  %v33_v22 = vrot.slane %v572_v16, 7  ;;  %v56_v24 = vrot.slane %v574_v19, 6  ;;  %vm67_vm12 = vcmask 517120   ;;  %vm171_vm13 = vcmask 523264   ;;  %v734_v50 = vld [vmem:[%s799_s2] ss:$0 sm:$0xff] }
   0x9   :  { %v35_v23 = vrot.slane %v573_v17, 7  ;;  %v58_v25 = vrot.slane %v575_v20, 6  ;;  %vm328_vm14 = vcmask 1045504   ;;  %vm303_vm15 = vcmask 1046528  }
   0xa   :  { %v34_v26 = vrot.slane %v33_v22, 4  ;;  %42 = vst.msk [vmem:[#allocation2] sm:$0xe] %vm41_vm7, %v33_v22  ;;  %v57_v28 = vrot.slane %v56_v24, 4  ;;  %vm493_vm3 = vcmask 1044480  }
   0xb   :  { %594 = vmatpush3.bf16.msra.mxu1 %v622_v9  ;;  %186 = vmatpush1.bf16.msra.mxu0 %v623_v10  ;;  %v37_v27 = vrot.slane %v35_v23, 4  ;;  %v60_v29 = vrot.slane %v58_v25, 4  ;;  %65 = vst.msk [vmem:[#allocation2 + $0x8] sm:$0xc] %vm64_vm8, %v56_v24  ;;  %vm455_vm4 = vsmask.f32 2304 }
   0xc   :  { %595 = vmatprep.subr.bf16.mxu1 %v631_v0  ;;  %187 = vmatprep.subr.bf16.mxu0 %v624_v11  ;;  %v36_v30 = vsel %vm32_vm9, %v34_v26, %v35_v23  ;;  %v59_v31 = vsel %vm55_vm11, %v57_v28, %v58_v25  ;;  %vm456_vm5 = vsmask.f32 6416 }
   0xd   :  { %45 = vst.msk [vmem:[#allocation2 + $0x8] sm:$0x1] %vm23_vm0, %v37_v27  ;;  %vm371_vm0 = vsmask.f32 3328  ;;  %vm775_vm6 = vmor %vm455_vm4, %vm456_vm5 }
   0xe   :  { %44 = vst.msk [vmem:[#allocation2 + $0x4] sm:$0xf] %vm43_vm10, %v36_v30  ;;  %66 = vst.msk [vmem:[#allocation2 + $0xc] sm:$0xf] %vm43_vm10, %v59_v31 }
   0xf   :  { %596 = vmatpush3.bf16.msra.mxu1 %v626_v18  ;;  %188 = vmatpush1.bf16.msra.mxu0 %v627_v21  ;;  %68 = vst.msk [vmem:[#allocation2 + $0x10] sm:$0x3] %vm67_vm12, %v60_v29 }
  0x15   :  { %v628_v32 = vld [vmem:[#allocation2] sm:$0xff]   ;;  %v629_v33 = vld [vmem:[#allocation2 + $0x8] sm:$0xff]  }
  0x16   :  { %598 = vmatmul.mubr.msk.bf16.vlgmr.msra.gmra.mrb[0].mxu1 %vm171_vm13, %v628_v32  ;;  %557 = vmatmul.mubr.msk.bf16.vlgmr.msra.gmra.mrb[0].mxu0 %vm171_vm13, %v628_v32  ;;  %v630_v34 = vld [vmem:[#allocation2 + $0x10] ss:$0 sps:$4 sm:$0xff]  }
  0x17   :  { %601 = vmatprep.mubr.msk.bf16.mxu1 %vm632_vm1, %v631_v0  ;;  %223 = vmatprep.mubr.bf16.mxu0 %v633_v2 }
  0x1e   :  { %602 = vmatmul.mubr.msk.bf16.gmra.mrb[4].mxu1 %vm171_vm13, %v629_v33  ;;  %558 = vmatmul.mubr.msk.bf16.gmra.mrb[4].mxu0 %vm171_vm13, %v629_v33 }
  0x1f   :  { %605 = vmatprep.mubr.msk.bf16.mxu1 %vm632_vm1, %v631_v0  ;;  %233 = vmatprep.mubr.bf16.mxu0 %v633_v2  ;;  %vm372_vm1 = vsmask.f32 7440 }
  0x20   :  { %vm748_vm2 = vmor %vm371_vm0, %vm372_vm1 }
  0x26   :  { %606 = vmatmul.mubr.msk.bf16.gmra.mrb[8].mxu1 %vm171_vm13, %v630_v34  ;;  %559 = vmatmul.mubr.msk.bf16.gmra.mrb[8].mxu0 %vm171_vm13, %v630_v34 }
  0xe9   :  { %v215_v35 = vpop.f32.mrb[0].mxu0  ;;  %v276_v36 = vpop.f32.mrb[0].mxu1 }
  0xea   :  { %v329_v37 = vrot.slane %v276_v36, 2  ;;  %v217_v38 = vpop.f32.mrb[1].mxu0  ;;  %v599_v39 = vpop.f32.mrb[1].mxu1 }
  0xeb   :  { %v219_v40 = vpop.f32.mrb[2].mxu0  ;;  %v279_v41 = vpop.f32.mrb[2].mxu1  ;;  %v304_v45 = vrot.slane %v217_v38, 1 }
  0xec   :  { %v330_v42 = vrot.slane %v279_v41, 2  ;;  %v221_v43 = vpop.f32.mrb[3].mxu0  ;;  %v600_v44 = vpop.f32.mrb[3].mxu1 }
  0xed   :  { %v305_v46 = vrot.slane %v221_v43, 1 }
  0xee   :  { %v331_v47 = vsel %vm328_vm14, %v329_v37, %v330_v42 }
  0xef   :  { %v306_v48 = vsel %vm303_vm15, %v304_v45, %v305_v46 }
  0xf0   :  { %v318_v49 = vadd.f32 %v306_v48, %v215_v35 }
  0xf1   :  { %v284_v51 = vpop.f32.mrb[4].mxu1  ;;  %v225_v52 = vpop.f32.mrb[4].mxu0 }
  0xf2   :  { %v343_v53 = vadd.f32 %v331_v47, %v318_v49  ;;  %v332_v54 = vrot.slane %v284_v51, 2  ;;  %v227_v55 = vpop.f32.mrb[5].mxu0  ;;  %v603_v56 = vpop.f32.mrb[5].mxu1 }
  0xf3   :  { %v307_v57 = vrot.slane %v227_v55, 1  ;;  %v229_v58 = vpop.f32.mrb[6].mxu0  ;;  %v287_v59 = vpop.f32.mrb[6].mxu1 }
  0xf4   :  { %v355_v60 = vadd.f32 %v734_v50, %v343_v53  ;;  %v333_v61 = vsel %vm328_vm14, %v330_v42, %v332_v54  ;;  %v334_v62 = vrot.slane %v287_v59, 2  ;;  %v231_v63 = vpop.f32.mrb[7].mxu0  ;;  %v604_v0 = vpop.f32.mrb[7].mxu1 }
  0xf5   :  { %v308_v1 = vsel %vm303_vm15, %v305_v46, %v307_v57  ;;  %v309_v2 = vrot.slane %v231_v63, 1 }
  0xf6   :  { %v358_v3 = vmax.f32 %v355_v60, 0.0  ;;  %v319_v4 = vadd.f32 %v308_v1, %v219_v40  ;;  %v335_v5 = vsel %vm328_vm14, %v332_v54, %v334_v62 }
  0xf7   :  { %v310_v6 = vsel %vm303_vm15, %v307_v57, %v309_v2 }
  0xf8   :  { %v576_v7 = vpack.c.bf16 %v358_v3, %v358_v3  ;;  %v344_v8 = vadd.f32 %v333_v61, %v319_v4  ;;  %v320_v9 = vadd.f32 %v310_v6, %v225_v52  ;;  %v405_v17 = vrot.slane %v358_v3, 1 }
  0xf9   :  { %v292_v10 = vpop.f32.mrb[8].mxu1  ;;  %v235_v11 = vpop.f32.mrb[8].mxu0  ;;  %v420_v25 = vmul.f32 %v358_v3, %v358_v3 }
  0xfa   :  { %v375_v12 = vshrl.u32 %v576_v7, 16  ;;  %v378_v13 = vshll.u32 %v576_v7, 16  ;;  %v356_v14 = vadd.f32 %v734_v50, %v344_v8  ;;  %v237_v15 = vpop.f32.mrb[9].mxu0  ;;  %v607_v16 = vpop.f32.mrb[9].mxu1  ;;  %v345_v18 = vadd.f32 %v335_v5, %v320_v9 }
  0xfb   :  { %v336_v19 = vrot.slane %v292_v10, 2  ;;  %v311_v20 = vrot.slane %v237_v15, 1  ;;  %v239_v21 = vpop.f32.mrb[10].mxu0  ;;  %v295_v22 = vpop.f32.mrb[10].mxu1  ;;  %v426_v40 = vrot.slane %v420_v25, 1 }
  0xfc   :  { %v377_v23 = vrot.slane %v375_v12, 4  ;;  %v380_v24 = vrot.slane %v378_v13, 5  ;;  %v359_v26 = vmax.f32 %v356_v14, 0.0  ;;  %v240_v27 = vpop.f32.mrb[11].mxu0  ;;  %v608_v28 = vpop.f32.mrb[11].mxu1  ;;  %v357_v29 = vadd.f32 %v734_v50, %v345_v18 }
  0xfd   :  { %v337_v30 = vsel %vm328_vm14, %v334_v62, %v336_v19  ;;  %v312_v31 = vsel %vm303_vm15, %v309_v2, %v311_v20  ;;  %v322_v32 = vadd.f32 %v311_v20, %v235_v11 }
  0xfe   :  { %v381_v33 = vor.u32 %v380_v24, %v377_v23  ;;  %v577_v34 = vpack.c.bf16 %v359_v26, %v359_v26  ;;  %v406_v35 = vrot.slane %v359_v26, 1  ;;  %v421_v36 = vmul.f32 %v359_v26, %v359_v26 }
  0xff   :  { %v360_v37 = vmax.f32 %v357_v29, 0.0  ;;  %v321_v38 = vadd.f32 %v312_v31, %v229_v58  ;;  %v347_v39 = vadd.f32 %v336_v19, %v322_v32 }
 0x100   :  { %v384_v41 = vshll.u32 %v577_v34, 16  ;;  %v388_v42 = vshrl.u32 %v577_v34, 16  ;;  %v407_v43 = vsel %vm303_vm15, %v405_v17, %v406_v35  ;;  %v427_v45 = vrot.slane %v421_v36, 1 }
 0x101   :  { %v578_v46 = vpack.c.bf16 %v360_v37, %v360_v37  ;;  %v408_v47 = vrot.slane %v360_v37, 1  ;;  %v752_v48 = vmul.f32 %v360_v37, %v360_v37  ;;  %v382_v49 = vrot.slane %v381_v33, 4 }
 0x102   :  { %v386_v51 = vrot.slane %v384_v41, 5  ;;  %v390_v52 = vrot.slane %v388_v42, 4  ;;  %v346_v53 = vadd.f32 %v337_v30, %v321_v38  ;;  %v428_v54 = vsel %vm303_vm15, %v426_v40, %v427_v45 }
 0x103   :  { %v394_v55 = vshll.u32 %v578_v46, 16  ;;  %v409_v56 = vsel %vm303_vm15, %v406_v35, %v408_v47  ;;  %v429_v57 = vrot.slane %v752_v48, 1  ;;  %v459_v61 = vshrl.u32 %v578_v46, 16 }
 0x104   :  { %v387_v58 = vsel %vm748_vm2, %v382_v49, %v386_v51  ;;  %v391_v59 = vor.u32 %v390_v52, %v386_v51  ;;  %v412_v60 = vadd.f32 %v409_v56, %v407_v43  ;;  %v441_v3 = vadd.f32 %v734_v50, %v346_v53 }
 0x105   :  { %400 = vst [vmem:[%s800_s3] sm:$0xf] %v387_v58  ;;  %v430_v62 = vsel %vm303_vm15, %v427_v45, %v429_v57  ;;  %v396_v0 = vrot.slane %v394_v55, 5  ;;  %v442_v4 = vadd.f32 %v734_v50, %v347_v39  ;;  %v461_v6 = vrot.slane %v459_v61, 5 }
 0x106   :  { %v392_v63 = vrot.slane %v391_v59, 4  ;;  %v413_v1 = vrot.slane %v412_v60, 4  ;;  %v433_v2 = vadd.f32 %v430_v62, %v428_v54  ;;  %v464_v7 = vrot.slane %v394_v55, 6 }
 0x107   :  { %v443_v8 = vmax.f32 %v441_v3, 0.0  ;;  %v444_v9 = vmax.f32 %v442_v4, 0.0  ;;  %v494_v11 = vrot.slane %v360_v37, 3  ;;  %v513_v23 = vrot.slane %v752_v48, 3 }
 0x108   :  { %v397_v5 = vsel %vm748_vm2, %v392_v63, %v396_v0  ;;  %v414_v10 = vadd.f32 %v413_v1, %v412_v60  ;;  %v434_v15 = vrot.slane %v433_v2, 4  ;;  %v465_v16 = vor.u32 %v464_v7, %v461_v6 }
 0x109   :  { %401 = vst [vmem:[%s800_s3 + $0x4] sm:$0xf] %v397_v5  ;;  %v580_v12 = vpack.c.bf16 %v443_v8, %v443_v8  ;;  %v581_v13 = vpack.c.bf16 %v444_v9, %v444_v9  ;;  %v495_v14 = vrot.slane %v443_v8, 3  ;;  %v497_v50 = vrot.slane %v444_v9, 3 }
 0x10a   :  { %v509_v17 = vmul.f32 %v443_v8, %v443_v8  ;;  %v510_v18 = vmul.f32 %v444_v9, %v444_v9  ;;  %v415_v30 = vrot.slane %v414_v10, 2  ;;  %v435_v31 = vadd.f32 %v434_v15, %v433_v2 }
 0x10b   :  { %v468_v19 = vshrl.u32 %v580_v12, 16  ;;  %v471_v20 = vshll.u32 %v580_v12, 16  ;;  %v478_v21 = vshrl.u32 %v581_v13, 16  ;;  %v481_v22 = vshll.u32 %v581_v13, 16 }
 0x10c   :  { %v496_v24 = vsel %vm493_vm3, %v494_v11, %v495_v14  ;;  %v498_v25 = vsel %vm493_vm3, %v495_v14, %v497_v50  ;;  %v514_v34 = vrot.slane %v509_v17, 3  ;;  %v466_v35 = vrot.slane %v465_v16, 4 }
 0x10d   :  { %v470_v26 = vrot.slane %v468_v19, 5  ;;  %v473_v27 = vrot.slane %v471_v20, 6  ;;  %v480_v28 = vrot.slane %v478_v21, 5  ;;  %v483_v29 = vrot.slane %v481_v22, 6 }
 0x10e   :  { %v501_v33 = vadd.f32 %v498_v25, %v496_v24  ;;  %v516_v37 = vrot.slane %v510_v18, 3  ;;  %v515_v39 = vsel %vm493_vm3, %v513_v23, %v514_v34  ;;  %v416_v44 = vadd.f32 %v415_v30, %v414_v10 }
 0x10f   :  { %v474_v36 = vor.u32 %v473_v27, %v470_v26  ;;  %v484_v42 = vor.u32 %v483_v29, %v480_v28  ;;  %v436_v45 = vrot.slane %v435_v31, 2 }
 0x110   :  { %v502_v38 = vrot.slane %v501_v33, 4  ;;  %v517_v43 = vsel %vm493_vm3, %v514_v34, %v516_v37  ;;  %v417_v52 = vrot.slane %v416_v44, 1 }
 0x111   :  { %v475_v40 = vsel %vm775_vm6, %v466_v35, %v474_v36  ;;  %v476_v41 = vrot.slane %v474_v36, 4  ;;  %v520_v47 = vadd.f32 %v517_v43, %v515_v39  ;;  %v437_v53 = vadd.f32 %v436_v45, %v435_v31 }
 0x112   :  { %570 = vst [vmem:[%s800_s3 + $0x8] sm:$0xf] %v475_v40  ;;  %v503_v46 = vadd.f32 %v502_v38, %v501_v33  ;;  %v418_v58 = vadd.f32 %v417_v52, %v416_v44 }
 0x113   :  { %v485_v48 = vsel %vm775_vm6, %v476_v41, %v484_v42  ;;  %v521_v51 = vrot.slane %v520_v47, 4  ;;  %v438_v59 = vrot.slane %v437_v53, 1 }
 0x114   :  { %571 = vst [vmem:[%s800_s3 + $0xc] sm:$0xf] %v485_v48  ;;  %v504_v49 = vrot.slane %v503_v46, 2 }
 0x115   :  { %v522_v55 = vadd.f32 %v521_v51, %v520_v47  ;;  %v439_v0 = vadd.f32 %v438_v59, %v437_v53 }
 0x116   :  { %v505_v54 = vadd.f32 %v504_v49, %v503_v46 }
 0x117   :  { %v523_v57 = vrot.slane %v522_v55, 2 }
 0x118   :  { %v506_v56 = vrot.slane %v505_v54, 1 }
 0x119   :  { %v524_v61 = vadd.f32 %v523_v57, %v522_v55 }
 0x11a   :  { %v507_v60 = vadd.f32 %v506_v56, %v505_v54 }
 0x11b   :  { %v525_v63 = vrot.slane %v524_v61, 1 }
 0x11c   :  { %v508_v62 = vadd.f32 %v507_v60, %v418_v58 }
 0x11d   :  { %v526_v1 = vadd.f32 %v525_v63, %v524_v61 }
 0x11e   :  { %528 = vst [vmem:[%s801_s4] sm:$0x1] %v508_v62 }
 0x11f   :  { %v527_v2 = vadd.f32 %v526_v1, %v439_v0 }
 0x121   :  { %529 = vst [vmem:[%s801_s4 + $0x1] sm:$0x1] %v527_v2 }

// kernel: conv_block_forward.3
= control target key start
LH: loop header
LB: loop body
LE: loop exit
PB: predicated region body
PF: predicated region fallthrough
CT: control target
= control target key end

     0   :  { %v682_v0 = vmov 0.0   ;;  %vm683_vm0 = vmmov 0   ;;  %v684_v2 = vmov 0   ;;  %vm61_vm1 = vcmask 1040384   ;;  %s877_s3 = inlined_call_operand.vmem [shape: bf16[128,384], index: 3, kind: input, shape index: {}]   ;;  %s878_s0 = inlined_call_operand.vmem [shape: bf16[2,16,128], index: 0, kind: input, shape index: {}]   ;;  %s879_s1 = inlined_call_operand.vmem [shape: f32[1,128], index: 1, kind: input, shape index: {}]   ;;  %s880_s2 = inlined_call_operand.vmem [shape: f32[1,128], index: 2, kind: input, shape index: {}]   ;;  %s881_s4 = inlined_call_operand.vmem [shape: f32[1,128], index: 4, kind: input, shape index: {}]   ;;  %s882_s5 = inlined_call_operand.vmem [shape: f32[2,16,128], index: 5, kind: output, shape index: {0}]   ;;  %s883_s6 = inlined_call_operand.vmem [shape: f32[1,2,128], index: 6, kind: output, shape index: {1}]  }
   0x1   :  { %616 = vmatprep.subr.bf16.mxu1 %v682_v0  ;;  %v647_v1 = vld [vmem:[%s877_s3 + $0x4] ss:$12 sps:$4 sm:$0xff]   ;;  %632 = vmatprep.mubr.msk.bf16.mxu1 %vm683_vm0, %v682_v0  ;;  %55 = vst [vmem:[#allocation2] sm:$0x1] %v684_v2  ;;  %75 = vst [vmem:[#allocation2 + $0x8] sm:$0x2] %v684_v2 }
   0x2   :  { %v649_v3 = vld [vmem:[%s877_s3 + $0x8] ss:$12 sps:$4 sm:$0xff]   ;;  %310 = vmatprep.mubr.bf16.mxu0 %v684_v2  ;;  %278 = vmatprep.subr.bf16.mxu0 %v647_v1  ;;  %v650_v4 = vld [vmem:[%s877_s3] ss:$12 sps:$4 sm:$0xff]   ;;  %v654_v7 = vld [vmem:[%s877_s3 + $0x18] ss:$12 sps:$4 sm:$0xff]  }
   0x3   :  { %617 = vmatpush3.bf16.msra.mxu1 %v649_v3  ;;  %v651_v5 = vld [vmem:[%s877_s3 + $0x1c] ss:$12 sps:$4 sm:$0xff]   ;;  %279 = vmatpush1.bf16.msra.mxu0 %v650_v4  ;;  %v653_v6 = vld [vmem:[%s877_s3 + $0x20] ss:$12 sps:$4 sm:$0xff]   ;;  %v657_v9 = vld [vmem:[%s877_s3 + $0x38] ss:$12 sps:$4 sm:$0xff]  }
   0x4   :  { %618 = vmatprep.subr.bf16.mxu1 %v682_v0  ;;  %280 = vmatprep.subr.bf16.mxu0 %v651_v5  ;;  %v655_v8 = vld [vmem:[%s877_s3 + $0x34] ss:$12 sps:$4 sm:$0xff]   ;;  %v658_v10 = vld [vmem:[%s877_s3 + $0x30] ss:$12 sps:$4 sm:$0xff]   ;;  %v659_v11 = vld [vmem:[%s877_s3 + $0x4c] ss:$12 sps:$4 sm:$0xff]  }
   0x5   :  { %v661_v12 = vld [vmem:[%s877_s3 + $0x50] ss:$12 sps:$4 sm:$0xff]   ;;  %v662_v13 = vld [vmem:[%s877_s3 + $0x48] ss:$12 sps:$4 sm:$0xff]   ;;  %v666_v16 = vld [vmem:[%s877_s3 + $0x60] ss:$12 sps:$4 sm:$0xff]  }
   0x6   :  { %v663_v14 = vld [vmem:[%s877_s3 + $0x64] ss:$12 sps:$4 sm:$0xff]   ;;  %v665_v15 = vld [vmem:[%s877_s3 + $0x68] ss:$12 sps:$4 sm:$0xff]   ;;  %v669_v19 = vld [vmem:[%s877_s3 + $0x80] ss:$12 sps:$4 sm:$0xff]  }
   0x7   :  { %619 = vmatpush3.bf16.msra.mxu1 %v653_v6  ;;  %281 = vmatpush1.bf16.msra.mxu0 %v654_v7  ;;  %v667_v17 = vld [vmem:[%s877_s3 + $0x7c] ss:$12 sps:$4 sm:$0xff]   ;;  %v597_v18 = vld [vmem:[%s878_s0] sm:$0xff]   ;;  %vm62_vm2 = vcmask 1044484   ;;  %v675_v37 = vld [vmem:[%s877_s3 + $0xac] ss:$12 sps:$4 sm:$0xff]  }
   0x8   :  { %620 = vmatprep.subr.bf16.mxu1 %v682_v0  ;;  %282 = vmatprep.subr.bf16.mxu0 %v655_v8  ;;  %v598_v20 = vunpack.c.l.bf16 %v597_v18  ;;  %v599_v21 = vunpack.c.h.bf16 %v597_v18  ;;  %v555_v22 = vld [vmem:[%s879_s1] ss:$0 sm:$0xff]  ;;  %v670_v23 = vld [vmem:[%s877_s3 + $0x78] ss:$12 sps:$4 sm:$0xff]   ;;  %v604_v25 = vld [vmem:[%s878_s0 + $0x8] sm:$0xff]   ;;  %vm81_vm3 = vcmask 1041408  }
   0x9   :  { %v556_v24 = vld [vmem:[%s880_s2] ss:$0 sm:$0xff]  ;;  %v602_v29 = vunpack.c.l.bf16 %v604_v25  ;;  %v603_v30 = vunpack.c.h.bf16 %v604_v25  ;;  %v673_v31 = vld [vmem:[%s877_s3 + $0x98] ss:$12 sps:$4 sm:$0xff]   ;;  %v674_v36 = vld [vmem:[%s877_s3 + $0x90] ss:$12 sps:$4 sm:$0xff]  }
   0xa   :  { %v671_v26 = vld [vmem:[%s877_s3 + $0x94] ss:$12 sps:$4 sm:$0xff]   ;;  %v38_v27 = vmul.f32 %v598_v20, %v555_v22  ;;  %v39_v28 = vmul.f32 %v599_v21, %v555_v22  ;;  %vm82_vm4 = vcmask 1045508   ;;  %v677_v42 = vld [vmem:[%s877_s3 + $0xb0] ss:$12 sps:$4 sm:$0xff]   ;;  %vm63_vm5 = vmor %vm61_vm1, %vm62_vm2  ;;  %vm425_vm7 = vcmask 1045504  }
   0xb   :  { %621 = vmatpush3.bf16.msra.mxu1 %v657_v9  ;;  %283 = vmatpush1.bf16.msra.mxu0 %v658_v10  ;;  %v40_v34 = vmul.f32 %v602_v29, %v555_v22  ;;  %v41_v35 = vmul.f32 %v603_v30, %v555_v22  ;;  %v678_v47 = vld [vmem:[%s877_s3 + $0xa8] ss:$12 sps:$4 sm:$0xff]   ;;  %vm83_vm6 = vmor %vm81_vm3, %vm82_vm4  ;;  %vm400_vm8 = vcmask 1046528   ;;  %v832_v10 = vld [vmem:[%s881_s4] ss:$0 sm:$0xff]  ;;  %vm510_vm9 = vcmask 1044480  }
   0xc   :  { %622 = vmatprep.subr.bf16.mxu1 %v682_v0  ;;  %284 = vmatprep.subr.bf16.mxu0 %v659_v11  ;;  %v49_v32 = vadd.f32 %v556_v24, %v38_v27  ;;  %v50_v33 = vadd.f32 %v556_v24, %v39_v28 }
   0xd   :  { %v51_v40 = vadd.f32 %v556_v24, %v40_v34  ;;  %v52_v41 = vadd.f32 %v556_v24, %v41_v35 }
   0xe   :  { %v592_v38 = vpack.c.bf16 %v49_v32, %v49_v32  ;;  %v593_v39 = vpack.c.bf16 %v50_v33, %v50_v33 }
   0xf   :  { %623 = vmatpush3.bf16.msra.mxu1 %v661_v12  ;;  %285 = vmatpush1.bf16.msra.mxu0 %v662_v13  ;;  %v594_v45 = vpack.c.bf16 %v51_v40, %v51_v40  ;;  %v595_v46 = vpack.c.bf16 %v52_v41, %v52_v41 }
  0x10   :  { %624 = vmatprep.subr.bf16.mxu1 %v682_v0  ;;  %286 = vmatprep.subr.bf16.mxu0 %v663_v14  ;;  %v64_v43 = vrot.slane %v592_v38, 7  ;;  %v66_v44 = vrot.slane %v593_v39, 7 }
  0x11   :  { %v84_v50 = vrot.slane %v594_v45, 6  ;;  %v86_v51 = vrot.slane %v595_v46, 6 }
  0x12   :  { %v65_v48 = vrot.slane %v64_v43, 4  ;;  %72 = vst [vmem:[#allocation2] sm:$0xe] %v64_v43  ;;  %v68_v49 = vrot.slane %v66_v44, 4 }
  0x13   :  { %625 = vmatpush3.bf16.msra.mxu1 %v665_v15  ;;  %287 = vmatpush1.bf16.msra.mxu0 %v666_v16  ;;  %v85_v53 = vrot.slane %v84_v50, 4  ;;  %92 = vst [vmem:[#allocation2 + $0x8] sm:$0xc] %v84_v50  ;;  %v88_v54 = vrot.slane %v86_v51, 4 }
  0x14   :  { %626 = vmatprep.subr.bf16.mxu1 %v682_v0  ;;  %288 = vmatprep.subr.bf16.mxu0 %v667_v17  ;;  %v67_v52 = vsel %vm63_vm5, %v65_v48, %v66_v44  ;;  %74 = vst [vmem:[#allocation2 + $0x8] sm:$0x1] %v68_v49 }
  0x15   :  { %73 = vst [vmem:[#allocation2 + $0x4] sm:$0xf] %v67_v52  ;;  %v87_v55 = vsel %vm83_vm6, %v85_v53, %v86_v51  ;;  %94 = vst [vmem:[#allocation2 + $0x10] sm:$0x3] %v88_v54 }
  0x16   :  { %93 = vst [vmem:[#allocation2 + $0xc] sm:$0xf] %v87_v55 }
  0x17   :  { %627 = vmatpush3.bf16.msra.mxu1 %v669_v19  ;;  %289 = vmatpush1.bf16.msra.mxu0 %v670_v23 }
  0x18   :  { %628 = vmatprep.subr.bf16.mxu1 %v682_v0  ;;  %290 = vmatprep.subr.bf16.mxu0 %v671_v26 }
  0x1b   :  { %629 = vmatpush3.bf16.msra.mxu1 %v673_v31  ;;  %291 = vmatpush1.bf16.msra.mxu0 %v674_v36 }
  0x1c   :  { %630 = vmatprep.subr.bf16.mxu1 %v682_v0  ;;  %292 = vmatprep.subr.bf16.mxu0 %v675_v37  ;;  %v679_v56 = vld [vmem:[#allocation2] sm:$0xff]   ;;  %v681_v58 = vld [vmem:[#allocation2 + $0x10] ss:$0 sps:$4 sm:$0xff]  }
  0x1d   :  { %v680_v57 = vld [vmem:[#allocation2 + $0x8] sm:$0xff]  }
  0x1f   :  { %631 = vmatpush3.bf16.msra.mxu1 %v677_v42  ;;  %293 = vmatpush1.bf16.msra.mxu0 %v678_v47 }
  0x22   :  { %633 = vmatmul.mubr.bf16.vlgmr.msra.gmra.mrb[0].mxu1 %v679_v56  ;;  %311 = vmatmul.mubr.bf16.vlgmr.msra.gmra.mrb[0].mxu0 %v679_v56 }
  0x23   :  { %636 = vmatprep.mubr.msk.bf16.mxu1 %vm683_vm0, %v682_v0  ;;  %320 = vmatprep.mubr.bf16.mxu0 %v684_v2 }
  0x2a   :  { %637 = vmatmul.mubr.bf16.gmra.mrb[4].mxu1 %v680_v57  ;;  %321 = vmatmul.mubr.bf16.gmra.mrb[4].mxu0 %v680_v57 }
  0x2b   :  { %640 = vmatprep.mubr.msk.bf16.mxu1 %vm683_vm0, %v682_v0  ;;  %330 = vmatprep.mubr.bf16.mxu0 %v684_v2 }
  0x32   :  { %641 = vmatmul.mubr.bf16.gmra.mrb[8].mxu1 %v681_v58  ;;  %331 = vmatmul.mubr.bf16.gmra.mrb[8].mxu0 %v681_v58 }
  0xf5   :  { %v312_v59 = vpop.f32.mrb[0].mxu0  ;;  %v373_v60 = vpop.f32.mrb[0].mxu1 }
  0xf6   :  { %v426_v61 = vrot.slane %v373_v60, 2  ;;  %v314_v62 = vpop.f32.mrb[1].mxu0  ;;  %v634_v63 = vpop.f32.mrb[1].mxu1 }
  0xf7   :  { %v316_v1 = vpop.f32.mrb[2].mxu0  ;;  %v376_v3 = vpop.f32.mrb[2].mxu1  ;;  %v401_v7 = vrot.slane %v314_v62, 1 }
  0xf8   :  { %v427_v4 = vrot.slane %v376_v3, 2  ;;  %v318_v5 = vpop.f32.mrb[3].mxu0  ;;  %v635_v6 = vpop.f32.mrb[3].mxu1 }
  0xf9   :  { %v402_v8 = vrot.slane %v318_v5, 1 }
  0xfa   :  { %v428_v0 = vsel %vm425_vm7, %v426_v61, %v427_v4 }
  0xfb   :  { %v403_v2 = vsel %vm400_vm8, %v401_v7, %v402_v8 }
  0xfc   :  { %v415_v9 = vadd.f32 %v403_v2, %v312_v59 }
  0xfd   :  { %v381_v11 = vpop.f32.mrb[4].mxu1  ;;  %v322_v12 = vpop.f32.mrb[4].mxu0 }
  0xfe   :  { %v440_v13 = vadd.f32 %v428_v0, %v415_v9  ;;  %v429_v14 = vrot.slane %v381_v11, 2  ;;  %v324_v15 = vpop.f32.mrb[5].mxu0  ;;  %v638_v16 = vpop.f32.mrb[5].mxu1 }
  0xff   :  { %v404_v17 = vrot.slane %v324_v15, 1  ;;  %v326_v18 = vpop.f32.mrb[6].mxu0  ;;  %v384_v19 = vpop.f32.mrb[6].mxu1 }
 0x100   :  { %v452_v20 = vadd.f32 %v832_v10, %v440_v13  ;;  %v430_v21 = vsel %vm425_vm7, %v427_v4, %v429_v14  ;;  %v431_v22 = vrot.slane %v384_v19, 2  ;;  %v328_v23 = vpop.f32.mrb[7].mxu0  ;;  %v639_v24 = vpop.f32.mrb[7].mxu1 }
 0x101   :  { %v405_v25 = vsel %vm400_vm8, %v402_v8, %v404_v17  ;;  %v406_v26 = vrot.slane %v328_v23, 1 }
 0x102   :  { %v455_v27 = vmax.f32 %v452_v20, 0.0  ;;  %v416_v28 = vadd.f32 %v405_v25, %v316_v1  ;;  %v432_v29 = vsel %vm425_vm7, %v429_v14, %v431_v22 }
 0x103   :  { %v407_v30 = vsel %vm400_vm8, %v404_v17, %v406_v26 }
 0x104   :  { %458 = vst [vmem:[%s882_s5 - $0x1] sm:$0xfe] %v455_v27  ;;  %v441_v31 = vadd.f32 %v430_v21, %v416_v28  ;;  %v417_v32 = vadd.f32 %v407_v30, %v322_v12  ;;  %v479_v40 = vmul.f32 %v455_v27, %v455_v27  ;;  %v464_v49 = vrot.slane %v455_v27, 1 }
 0x105   :  { %v389_v33 = vpop.f32.mrb[8].mxu1  ;;  %v332_v34 = vpop.f32.mrb[8].mxu0 }
 0x106   :  { %v453_v35 = vadd.f32 %v832_v10, %v441_v31  ;;  %v442_v36 = vadd.f32 %v432_v29, %v417_v32  ;;  %v433_v37 = vrot.slane %v389_v33, 2  ;;  %v334_v38 = vpop.f32.mrb[9].mxu0  ;;  %v642_v39 = vpop.f32.mrb[9].mxu1  ;;  %v485_v56 = vrot.slane %v479_v40, 1 }
 0x107   :  { %v408_v41 = vrot.slane %v334_v38, 1  ;;  %v336_v42 = vpop.f32.mrb[10].mxu0  ;;  %v392_v43 = vpop.f32.mrb[10].mxu1 }
 0x108   :  { %v456_v44 = vmax.f32 %v453_v35, 0.0  ;;  %v454_v45 = vadd.f32 %v832_v10, %v442_v36  ;;  %v434_v46 = vsel %vm425_vm7, %v431_v22, %v433_v37  ;;  %v337_v47 = vpop.f32.mrb[11].mxu0  ;;  %v643_v48 = vpop.f32.mrb[11].mxu1 }
 0x109   :  { %v409_v50 = vsel %vm400_vm8, %v406_v26, %v408_v41  ;;  %v419_v51 = vadd.f32 %v408_v41, %v332_v34 }
 0x10a   :  { %459 = vst [vmem:[%s882_s5 + $0x7] sm:$0xff] %v456_v44  ;;  %v465_v52 = vrot.slane %v456_v44, 1  ;;  %v480_v53 = vmul.f32 %v456_v44, %v456_v44  ;;  %v457_v54 = vmax.f32 %v454_v45, 0.0  ;;  %v418_v55 = vadd.f32 %v409_v50, %v326_v18 }
 0x10b   :  { %v444_v57 = vadd.f32 %v433_v37, %v419_v51 }
 0x10c   :  { %v466_v58 = vsel %vm400_vm8, %v464_v49, %v465_v52  ;;  %v486_v59 = vrot.slane %v480_v53, 1  ;;  %460 = vst [vmem:[%s882_s5 + $0xf] sm:$0x1] %v457_v54  ;;  %v467_v60 = vrot.slane %v457_v54, 1  ;;  %v481_v61 = vmul.f32 %v457_v54, %v457_v54  ;;  %589 = vst [vmem:[%s882_s5 + $0xd] sm:$0xf8] %v457_v54 }
 0x10d   :  { %v443_v62 = vadd.f32 %v434_v46, %v418_v55  ;;  %v501_v63 = vadd.f32 %v832_v10, %v444_v57  ;;  %v511_v12 = vrot.slane %v457_v54, 3 }
 0x10e   :  { %v487_v1 = vsel %vm400_vm8, %v485_v56, %v486_v59  ;;  %v468_v3 = vsel %vm400_vm8, %v465_v52, %v467_v60  ;;  %v488_v4 = vrot.slane %v481_v61, 1  ;;  %v530_v23 = vrot.slane %v481_v61, 3 }
 0x10f   :  { %v471_v5 = vadd.f32 %v468_v3, %v466_v58  ;;  %v500_v6 = vadd.f32 %v832_v10, %v443_v62  ;;  %v503_v7 = vmax.f32 %v501_v63, 0.0 }
 0x110   :  { %v489_v8 = vsel %vm400_vm8, %v486_v59, %v488_v4 }
 0x111   :  { %v472_v0 = vrot.slane %v471_v5, 4  ;;  %v492_v2 = vadd.f32 %v489_v8, %v487_v1  ;;  %v502_v9 = vmax.f32 %v500_v6, 0.0  ;;  %591 = vst [vmem:[%s882_s5 + $0x1d] sm:$0x7] %v503_v7  ;;  %v514_v11 = vrot.slane %v503_v7, 3 }
 0x112   :  { %v527_v13 = vmul.f32 %v503_v7, %v503_v7 }
 0x113   :  { %v473_v14 = vadd.f32 %v472_v0, %v471_v5  ;;  %v493_v15 = vrot.slane %v492_v2, 4  ;;  %590 = vst [vmem:[%s882_s5 + $0x15] sm:$0xff] %v502_v9  ;;  %v512_v10 = vrot.slane %v502_v9, 3  ;;  %v526_v16 = vmul.f32 %v502_v9, %v502_v9 }
 0x114   :  { %v533_v17 = vrot.slane %v527_v13, 3 }
 0x115   :  { %v494_v18 = vadd.f32 %v493_v15, %v492_v2  ;;  %v513_v19 = vsel %vm510_vm9, %v511_v12, %v512_v10  ;;  %v515_v20 = vsel %vm510_vm9, %v512_v10, %v514_v11  ;;  %v474_v21 = vrot.slane %v473_v14, 2 }
 0x116   :  { %v518_v22 = vadd.f32 %v515_v20, %v513_v19  ;;  %v531_v24 = vrot.slane %v526_v16, 3 }
 0x117   :  { %v495_v28 = vrot.slane %v494_v18, 2  ;;  %v475_v30 = vadd.f32 %v474_v21, %v473_v14 }
 0x118   :  { %v519_v25 = vrot.slane %v518_v22, 4  ;;  %v532_v26 = vsel %vm510_vm9, %v530_v23, %v531_v24  ;;  %v534_v27 = vsel %vm510_vm9, %v531_v24, %v533_v17 }
 0x119   :  { %v537_v29 = vadd.f32 %v534_v27, %v532_v26  ;;  %v496_v34 = vadd.f32 %v495_v28, %v494_v18  ;;  %v476_v36 = vrot.slane %v475_v30, 1 }
 0x11a   :  { %v520_v31 = vadd.f32 %v519_v25, %v518_v22 }
 0x11b   :  { %v538_v32 = vrot.slane %v537_v29, 4  ;;  %v497_v40 = vrot.slane %v496_v34, 1  ;;  %v477_v42 = vadd.f32 %v476_v36, %v475_v30 }
 0x11c   :  { %v521_v33 = vrot.slane %v520_v31, 2 }
 0x11d   :  { %v539_v35 = vadd.f32 %v538_v32, %v537_v29  ;;  %v498_v46 = vadd.f32 %v497_v40, %v496_v34 }
 0x11e   :  { %v522_v37 = vadd.f32 %v521_v33, %v520_v31 }
 0x11f   :  { %v540_v38 = vrot.slane %v539_v35, 2 }
 0x120   :  { %v523_v39 = vrot.slane %v522_v37, 1 }
 0x121   :  { %v541_v41 = vadd.f32 %v540_v38, %v539_v35 }
 0x122   :  { %v524_v43 = vadd.f32 %v523_v39, %v522_v37 }
 0x123   :  { %v542_v44 = vrot.slane %v541_v41, 1 }
 0x124   :  { %v525_v45 = vadd.f32 %v524_v43, %v477_v42 }
 0x125   :  { %v543_v47 = vadd.f32 %v542_v44, %v541_v41 }
 0x126   :  { %545 = vst [vmem:[%s883_s6] sm:$0x1] %v525_v45 }
 0x127   :  { %v544_v48 = vadd.f32 %v543_v47, %v498_v46 }
 0x129   :  { %546 = vst [vmem:[%s883_s6 + $0x1] sm:$0x1] %v544_v48 }

</bundles_post_ra>
